<compile_context>
chip_gen: v6e
topology: v6e:2x2x1
jax: 0.10.0
libtpu: 0.0.40
codegen_flags: <defaults>
</compile_context>

<pallas_src>
import jax
import jax.numpy as jnp
import numpy as np
from jax.experimental import pallas as pl
from jax.experimental.pallas import tpu as pltpu

CHN_MID = 32
EPS = 0.1
LANE = 128
PT_MAX = 32 * 1024      # pixels (lanes) per grid step
MIN_STEPS = 2           # aim for >= 2 grid steps (v7x has 2 TensorCores)


def _cdiv(a, b):
    return -(-a // b)


def dist2logit_kernel(d01_ref, w1_ref, b1_ref, w2_ref, b2_ref, w3_ref, b3_ref,
                      o_ref):
    x01 = d01_ref[...]                        # (2, PT): rows [d0; d1]
    pt = x01.shape[1]

    d0 = x01[0:1, :]
    d1 = x01[1:2, :]

    # f3 = d0/(d1+eps), f4 = d1/(d0+eps) computed together on the (2, PT) tile.
    den = jnp.concatenate([d1, d0], axis=0) + EPS          # (2, PT)
    r = pl.reciprocal(den, approx=True)                    # EUP slot (cheap)
    r = r * (2.0 - den * r)                                 # Newton-Raphson #1
    r = r * (2.0 - den * r)                                 # Newton-Raphson #2
    f34 = x01 * r                                           # (2, PT)

    # (8, PT) feature slab: [d0, d1, f3, f4, 0, 0, 0, 0].  (d0-d1 is folded
    # into the layer-1 weights in the wrapper; K padded to 8 for the MXU.)
    feat = jnp.concatenate(
        [x01, f34, jnp.zeros((4, pt), jnp.float32)], axis=0)   # (8, PT)

    # Layer 1 (5 -> 32, folded to 4 -> 32, padded to 8): MXU matmul.
    h = jnp.dot(w1_ref[...], feat,
                preferred_element_type=jnp.float32) + b1_ref[...]   # (32, PT)
    h = jnp.maximum(h, 0.2 * h)

    # Layer 2 (32 -> 32): MXU matmul, pixels on the lane/N axis.
    h = jnp.dot(w2_ref[...], h,
                preferred_element_type=jnp.float32) + b2_ref[...]   # (32, PT)
    h = jnp.maximum(h, 0.2 * h)

    # Layer 3 (32 -> 1) + sigmoid: lane-dense (1, PT) result.
    logit = jnp.dot(w3_ref[...], h,
                    preferred_element_type=jnp.float32) + b3_ref[...]
    o_ref[...] = jax.nn.sigmoid(logit)


def _fold_w1(w1):
    """Fold the (d0 - d1) feature into the layer-1 weight and pad K to 8.

    w1: (32, 5) = PyTorch Conv2d(5, 32, 1) weight squeezed, columns ordered
    [d0, d1, d0-d1, d0/(d1+eps), d1/(d0+eps)].  Returns (32, 8)."""
    w1 = w1.astype(jnp.float32)
    w1_eff = jnp.stack(
        [w1[:, 0] + w1[:, 2],      # coefficient on d0
         w1[:, 1] - w1[:, 2],      # coefficient on d1
         w1[:, 3],                 # coefficient on d0/(d1+eps)
         w1[:, 4]],                # coefficient on d1/(d0+eps)
        axis=1)                                            # (32, 4)
    return jnp.concatenate(
        [w1_eff, jnp.zeros((CHN_MID, 4), jnp.float32)], axis=1)   # (32, 8)


def dist2logit_pallas(d0, d1, params):
    """d0, d1: (N, 1, H, W) float32.  Returns (N, 1, H, W) float32."""
    w1, b1, w2, b2, w3, b3 = params
    N, C, H, W = d0.shape
    assert C == 1
    M = N * H * W

    w1p = _fold_w1(w1)

    # Stack d0/d1 into one (2, M) array: a single lane-dense DMA per step.
    d01 = jnp.concatenate(
        [d0.reshape(1, M).astype(jnp.float32),
         d1.reshape(1, M).astype(jnp.float32)], axis=0)            # (2, M)

    # Tile size: large (up to 32K lanes) to amortize per-step overhead, but
    # small enough that the grid has >= MIN_STEPS steps (v7x dual TensorCore).
    m_lanes = _cdiv(M, LANE)
    pt = min(PT_MAX, max(LANE, _cdiv(m_lanes, MIN_STEPS) * LANE))
    n_steps = _cdiv(M, pt)
    M_pad = n_steps * pt

    # Pad to a whole number of blocks with 1.0 (keeps the divides finite) so
    # there are no partial tail blocks / garbage lanes.
    if M_pad != M:
        d01 = jnp.pad(d01, ((0, 0), (0, M_pad - M)), constant_values=1.0)

    in_spec = pl.BlockSpec((2, pt), lambda i: (0, i))
    out_spec = pl.BlockSpec((1, pt), lambda i: (0, i))
    full = lambda shape: pl.BlockSpec(shape, lambda i: (0, 0))

    cost = pl.CostEstimate(
        flops=2 * CHN_MID * (8 + CHN_MID + 1) * M_pad,
        transcendentals=3 * M_pad,                 # 2 reciprocals + 1 sigmoid
        bytes_accessed=3 * 4 * M_pad)              # read (2,M), write (1,M)

    out = pl.pallas_call(
        dist2logit_kernel,
        out_shape=jax.ShapeDtypeStruct((1, M_pad), jnp.float32),
        grid_spec=pltpu.PrefetchScalarGridSpec(
            num_scalar_prefetch=0,
            grid=(n_steps,),
            in_specs=[
                in_spec,
                full((CHN_MID, 8)), full((CHN_MID, 1)),
                full((CHN_MID, CHN_MID)), full((CHN_MID, 1)),
                full((1, CHN_MID)), full((1, 1)),
            ],
            out_specs=out_spec,
        ),
        compiler_params=pltpu.CompilerParams(
            dimension_semantics=("parallel",),
            vmem_limit_bytes=48 * 1024 * 1024),
        cost_estimate=cost,
    )(d01, w1p, b1, w2, b2, w3, b3)

    if M_pad != M:
        out = out[:, :M]
    return out.reshape(N, 1, H, W)


def init_params(key):
    """Synthetic weights with PyTorch Conv2d shapes (squeezed):
       w: (out_ch, in_ch), b: (out_ch, 1)."""
    k1, k2, k3, k4, k5, k6 = jax.random.split(key, 6)
    w1 = jax.random.normal(k1, (CHN_MID, 5), jnp.float32) * 0.3
    b1 = jax.random.normal(k2, (CHN_MID, 1), jnp.float32) * 0.1
    w2 = jax.random.normal(k3, (CHN_MID, CHN_MID), jnp.float32) * 0.15
    b2 = jax.random.normal(k4, (CHN_MID, 1), jnp.float32) * 0.1
    w3 = jax.random.normal(k5, (1, CHN_MID), jnp.float32) * 0.3
    b3 = jax.random.normal(k6, (1, 1), jnp.float32) * 0.1
    return (w1, b1, w2, b2, w3, b3)


def dist2logit_ref(d0, d1, params, eps=EPS):
    """Pure-JAX reference of the PyTorch forward (NCHW)."""
    w1, b1, w2, b2, w3, b3 = params
    x = jnp.concatenate(
        (d0, d1, d0 - d1, d0 / (d1 + eps), d1 / (d0 + eps)), axis=1)  # (N,5,H,W)

    def conv1x1(x, w, b):
        y = jnp.einsum('oc,nchw->nohw', w, x,
                       precision=jax.lax.Precision.HIGHEST)
        return y + b[None, :, :, None]

    h = conv1x1(x, w1, b1)
    h = jnp.maximum(h, 0.2 * h)
    h = conv1x1(h, w2, b2)
    h = jnp.maximum(h, 0.2 * h)
    return jax.nn.sigmoid(conv1x1(h, w3, b3))


def _check(d0, d1, params):
    out = jax.block_until_ready(dist2logit_pallas(d0, d1, params))
    ref = dist2logit_ref(d0, d1, params)
    np.testing.assert_allclose(np.asarray(out), np.asarray(ref),
                               rtol=1e-4, atol=1e-5)


if __name__ == "__main__":
    key = jax.random.PRNGKey(0)
    kd0, kd1, kp = jax.random.split(key, 3)
    params = init_params(kp)

    # Test 1: small shape (2-step grid, 256 lanes/step).
    N, H, W = 2, 16, 16
    d0 = jnp.abs(jax.random.normal(kd0, (N, 1, H, W), jnp.float32))
    d1 = jnp.abs(jax.random.normal(kd1, (N, 1, H, W), jnp.float32))
    _check(d0, d1, params)

    # Test 2: larger multi-tile grid (2 x 16K-pixel steps) exercising pipeline.
    N2, H2, W2 = 2, 128, 128
    d0b = jnp.abs(jax.random.normal(kd0, (N2, 1, H2, W2), jnp.float32))
    d1b = jnp.abs(jax.random.normal(kd1, (N2, 1, H2, W2), jnp.float32))
    _check(d0b, d1b, params)

    # Test 3: non-lane-aligned pixel count -> exercises the 1.0-padding path.
    N3, H3, W3 = 1, 10, 13
    d0c = jnp.abs(jax.random.normal(kd0, (N3, 1, H3, W3), jnp.float32))
    d1c = jnp.abs(jax.random.normal(kd1, (N3, 1, H3, W3), jnp.float32))
    _check(d0c, d1c, params)

    print("KERNEL_OK")
</pallas_src>

<mosaic_0001>
module attributes {stable_mosaic.version = 11 : i64} {
  func.func @dist2logit_kernel(%arg0: i32, %arg1: memref<2x256xf32, #tpu.memory_space<vmem>>, %arg2: memref<32x8xf32, #tpu.memory_space<vmem>>, %arg3: memref<32x1xf32, #tpu.memory_space<vmem>>, %arg4: memref<32x32xf32, #tpu.memory_space<vmem>>, %arg5: memref<32x1xf32, #tpu.memory_space<vmem>>, %arg6: memref<1x32xf32, #tpu.memory_space<vmem>>, %arg7: memref<1x1xf32, #tpu.memory_space<vmem>>, %arg8: memref<1x256xf32, #tpu.memory_space<vmem>>) attributes {dimension_semantics = [#tpu.dimension_semantics<parallel>], iteration_bounds = array<i64: 2>, scalar_prefetch = 0 : i64, scratch_operands = 0 : i64, tpu.core_type = #tpu.core_type<tc>, window_params = [{transform_indices = @transform_0, window_bounds = array<i64: 2, 256>}, {pipeline_mode = #tpu.pipeline_mode<synchronous>, transform_indices = @transform_1, window_bounds = array<i64: 32, 8>}, {pipeline_mode = #tpu.pipeline_mode<synchronous>, transform_indices = @transform_2, window_bounds = array<i64: 32, 1>}, {pipeline_mode = #tpu.pipeline_mode<synchronous>, transform_indices = @transform_3, window_bounds = array<i64: 32, 32>}, {pipeline_mode = #tpu.pipeline_mode<synchronous>, transform_indices = @transform_4, window_bounds = array<i64: 32, 1>}, {pipeline_mode = #tpu.pipeline_mode<synchronous>, transform_indices = @transform_5, window_bounds = array<i64: 1, 32>}, {pipeline_mode = #tpu.pipeline_mode<synchronous>, transform_indices = @transform_6, window_bounds = array<i64: 1, 1>}, {transform_indices = @transform_7, window_bounds = array<i64: 1, 256>}]} {
    %c0 = arith.constant 0 : index
    %c0_0 = arith.constant 0 : index
    %0 = vector.load %arg1[%c0, %c0_0] : memref<2x256xf32, #tpu.memory_space<vmem>>, vector<2x256xf32>
    %1 = vector.extract_strided_slice %0 {offsets = [0, 0], sizes = [1, 256], strides = [1, 1]} : vector<2x256xf32> to vector<1x256xf32>
    %2 = vector.extract_strided_slice %0 {offsets = [1, 0], sizes = [1, 256], strides = [1, 1]} : vector<2x256xf32> to vector<1x256xf32>
    %3 = tpu.concatenate %2, %1 in 0 : vector<1x256xf32>, vector<1x256xf32> -> vector<2x256xf32>
    %cst = arith.constant 1.000000e-01 : f32
    %4 = vector.broadcast %cst : f32 to vector<2x256xf32>
    %5 = arith.addf %3, %4 : vector<2x256xf32>
    %6 = tpu.reciprocal %5 {approx = true} : vector<2x256xf32> -> vector<2x256xf32>
    %7 = arith.mulf %5, %6 : vector<2x256xf32>
    %cst_1 = arith.constant 2.000000e+00 : f32
    %8 = vector.broadcast %cst_1 : f32 to vector<2x256xf32>
    %9 = arith.subf %8, %7 : vector<2x256xf32>
    %10 = arith.mulf %6, %9 : vector<2x256xf32>
    %11 = arith.mulf %5, %10 : vector<2x256xf32>
    %cst_2 = arith.constant 2.000000e+00 : f32
    %12 = vector.broadcast %cst_2 : f32 to vector<2x256xf32>
    %13 = arith.subf %12, %11 : vector<2x256xf32>
    %14 = arith.mulf %10, %13 : vector<2x256xf32>
    %15 = arith.mulf %0, %14 : vector<2x256xf32>
    %cst_3 = arith.constant 0.000000e+00 : f32
    %16 = vector.broadcast %cst_3 : f32 to vector<4x256xf32>
    %17 = tpu.concatenate %0, %15, %16 in 0 : vector<2x256xf32>, vector<2x256xf32>, vector<4x256xf32> -> vector<8x256xf32>
    %c0_4 = arith.constant 0 : index
    %c0_5 = arith.constant 0 : index
    %18 = vector.load %arg2[%c0_4, %c0_5] : memref<32x8xf32, #tpu.memory_space<vmem>>, vector<32x8xf32>
    %cst_6 = arith.constant dense<0.000000e+00> : vector<32x256xf32>
    %19 = tpu.matmul %18, %17, %cst_6 {dimension_numbers = #tpu.dot_dimension_numbers<[1], [0], [0], [1], [0, 0, 1, 1], [], []>} : vector<32x8xf32>, vector<8x256xf32>, vector<32x256xf32> -> vector<32x256xf32>
    %c0_7 = arith.constant 0 : index
    %c0_8 = arith.constant 0 : index
    %20 = vector.load %arg3[%c0_7, %c0_8] : memref<32x1xf32, #tpu.memory_space<vmem>>, vector<32x1xf32>
    %21 = vector.broadcast %20 : vector<32x1xf32> to vector<32x256xf32>
    %22 = arith.addf %19, %21 : vector<32x256xf32>
    %cst_9 = arith.constant 2.000000e-01 : f32
    %23 = vector.broadcast %cst_9 : f32 to vector<32x256xf32>
    %24 = arith.mulf %23, %22 : vector<32x256xf32>
    %25 = arith.maximumf %22, %24 : vector<32x256xf32>
    %c0_10 = arith.constant 0 : index
    %c0_11 = arith.constant 0 : index
    %26 = vector.load %arg4[%c0_10, %c0_11] : memref<32x32xf32, #tpu.memory_space<vmem>>, vector<32x32xf32>
    %cst_12 = arith.constant dense<0.000000e+00> : vector<32x256xf32>
    %27 = tpu.matmul %26, %25, %cst_12 {dimension_numbers = #tpu.dot_dimension_numbers<[1], [0], [0], [1], [0, 0, 1, 1], [], []>} : vector<32x32xf32>, vector<32x256xf32>, vector<32x256xf32> -> vector<32x256xf32>
    %c0_13 = arith.constant 0 : index
    %c0_14 = arith.constant 0 : index
    %28 = vector.load %arg5[%c0_13, %c0_14] : memref<32x1xf32, #tpu.memory_space<vmem>>, vector<32x1xf32>
    %29 = vector.broadcast %28 : vector<32x1xf32> to vector<32x256xf32>
    %30 = arith.addf %27, %29 : vector<32x256xf32>
    %cst_15 = arith.constant 2.000000e-01 : f32
    %31 = vector.broadcast %cst_15 : f32 to vector<32x256xf32>
    %32 = arith.mulf %31, %30 : vector<32x256xf32>
    %33 = arith.maximumf %30, %32 : vector<32x256xf32>
    %c0_16 = arith.constant 0 : index
    %c0_17 = arith.constant 0 : index
    %34 = vector.load %arg6[%c0_16, %c0_17] : memref<1x32xf32, #tpu.memory_space<vmem>>, vector<1x32xf32>
    %cst_18 = arith.constant dense<0.000000e+00> : vector<1x256xf32>
    %35 = tpu.matmul %34, %33, %cst_18 {dimension_numbers = #tpu.dot_dimension_numbers<[1], [0], [0], [1], [0, 0, 1, 1], [], []>} : vector<1x32xf32>, vector<32x256xf32>, vector<1x256xf32> -> vector<1x256xf32>
    %c0_19 = arith.constant 0 : index
    %c0_20 = arith.constant 0 : index
    %36 = vector.load %arg7[%c0_19, %c0_20] : memref<1x1xf32, #tpu.memory_space<vmem>>, vector<1x1xf32>
    %37 = vector.broadcast %36 : vector<1x1xf32> to vector<1x256xf32>
    %38 = arith.addf %35, %37 : vector<1x256xf32>
    %39 = arith.negf %38 : vector<1x256xf32>
    %40 = math.exp %39 : vector<1x256xf32>
    %cst_21 = arith.constant 1.000000e+00 : f32
    %41 = vector.broadcast %cst_21 : f32 to vector<1x256xf32>
    %42 = arith.addf %41, %40 : vector<1x256xf32>
    %43 = arith.divf %41, %42 : vector<1x256xf32>
    %c0_22 = arith.constant 0 : index
    %c0_23 = arith.constant 0 : index
    %44 = vector.load %arg8[%c0_22, %c0_23] : memref<1x256xf32, #tpu.memory_space<vmem>>, vector<1x256xf32>
    tpu.vector_store %arg8[%c0_22, %c0_23], %43 {strides = array<i32>} : memref<1x256xf32, #tpu.memory_space<vmem>>, vector<1x256xf32>,
    return
  }
  func.func @transform_0(%arg0: i32) -> (i32, i32) {
    %c0_i32 = arith.constant 0 : i32
    %c0_i32_0 = arith.constant 0 : i32
    return %c0_i32, %arg0 : i32, i32
  }
  func.func @transform_1(%arg0: i32) -> (i32, i32) {
    %c0_i32 = arith.constant 0 : i32
    %c0_i32_0 = arith.constant 0 : i32
    %c0_i32_1 = arith.constant 0 : i32
    return %c0_i32, %c0_i32_0 : i32, i32
  }
  func.func @transform_2(%arg0: i32) -> (i32, i32) {
    %c0_i32 = arith.constant 0 : i32
    %c0_i32_0 = arith.constant 0 : i32
    %c0_i32_1 = arith.constant 0 : i32
    return %c0_i32, %c0_i32_0 : i32, i32
  }
  func.func @transform_3(%arg0: i32) -> (i32, i32) {
    %c0_i32 = arith.constant 0 : i32
    %c0_i32_0 = arith.constant 0 : i32
    %c0_i32_1 = arith.constant 0 : i32
    return %c0_i32, %c0_i32_0 : i32, i32
  }
  func.func @transform_4(%arg0: i32) -> (i32, i32) {
    %c0_i32 = arith.constant 0 : i32
    %c0_i32_0 = arith.constant 0 : i32
    %c0_i32_1 = arith.constant 0 : i32
    return %c0_i32, %c0_i32_0 : i32, i32
  }
  func.func @transform_5(%arg0: i32) -> (i32, i32) {
    %c0_i32 = arith.constant 0 : i32
    %c0_i32_0 = arith.constant 0 : i32
    %c0_i32_1 = arith.constant 0 : i32
    return %c0_i32, %c0_i32_0 : i32, i32
  }
  func.func @transform_6(%arg0: i32) -> (i32, i32) {
    %c0_i32 = arith.constant 0 : i32
    %c0_i32_0 = arith.constant 0 : i32
    %c0_i32_1 = arith.constant 0 : i32
    return %c0_i32, %c0_i32_0 : i32, i32
  }
  func.func @transform_7(%arg0: i32) -> (i32, i32) {
    %c0_i32 = arith.constant 0 : i32
    %c0_i32_0 = arith.constant 0 : i32
    return %c0_i32, %arg0 : i32, i32
  }
}

</mosaic_0001>

<bundles_post_ra>
// kernel: tpu_custom_call.1
= control target key start
LH: loop header
LB: loop body
LE: loop exit
PB: predicated region body
PF: predicated region fallthrough
CT: control target
= control target key end

     0   :  { %s1207_s0 = inlined_call_operand.vmem [shape: f32[2,512], index: 0, kind: input, shape index: {}]   ;;  %s1208_s1 = inlined_call_operand.vmem [shape: f32[32,8], index: 1, kind: input, shape index: {}]   ;;  %s1209_s2 = inlined_call_operand.vmem [shape: f32[32,1], index: 2, kind: input, shape index: {}]   ;;  %s1210_s3 = inlined_call_operand.vmem [shape: f32[32,32], index: 3, kind: input, shape index: {}]   ;;  %s1211_s4 = inlined_call_operand.vmem [shape: f32[32,1], index: 4, kind: input, shape index: {}]   ;;  %s1212_s5 = inlined_call_operand.vmem [shape: f32[1,32], index: 5, kind: input, shape index: {}]   ;;  %s1213_s6 = inlined_call_operand.<no memory space> [shape: f32[1,1], index: 6, kind: input, shape index: {}]   ;;  %s1214_s7 = inlined_call_operand.hbm [shape: f32[1,512], index: 7, kind: output, shape index: {}]  }
   0x1   :  { %v12_v0 = vstv %s1213_s6 }
   0x2   :  { %13 = vst [vmem:[#allocation2] sm:$0x1] %v12_v0 }
   0x3   :  { %14 = vsyncpa [#allocation4], 0 }
   0x4   :  { %16 = vsyncpa [#allocation4 + $0x1], 0  ;;  %s1042_s26 = smov 0   ;;  %s1044_s27 = smov 0  }
   0x5   :  { %s1046_s28 = smov 0   ;;  %s1048_s29 = smov 0  }
   0x6 LB: > { %s1063_s6 = sadd.s32 4294967295, %s992_s29   ;;  %s849_s30 = sadd.s32 4294967294, %s992_s29   ;;  %s992_s29 = sphi %s1048_s29, %s1220_s29   ;;  %s988_s28 = sphi %s1046_s28, %s1219_s28   ;;  %s984_s27 = sphi %s1044_s27, %s1218_s27   ;;  %s980_s26 = sphi %s1042_s26, %s1217_s26  }
   0x7   : > { %s1067_s8 = sadd.s32 1, %s992_s29   ;;  %s181_s9 = sadd.s32 1, %s988_s28 }
   0x8   : > { %s178_s10 = ssub.s32 %s992_s29, %s1067_s8  ;;  %p191_p0 = scmp.ne.s32.totalorder %s988_s28, %s984_s27 }
   0x9   : > { %p179_p1 = scmp.eq.s32.totalorder %s178_s10, 0  ;;  %p192_p2 = scmp.eq.s32.totalorder %s1063_s6, 1 }
   0xa   : > { %p197_p3 = scmp.ne.s32.totalorder %s984_s27, %s980_s26  ;;  %p198_p4 = scmp.eq.s32.totalorder %s849_s30, 1 }
   0xb   : > { %s1078_s11 = scalar_select %p179_p1, %s988_s28, %s181_s9  }
   0xc   : > { %p1080_p5 = por %p192_p2, %p191_p0  ;;  %p1084_p6 = por %p198_p4, %p197_p3 }
   0xd   : > { %p852_p7 = scmp.ge.s32.totalorder %s992_s29, 1  ;;  %p243_p8 = scmp.lt.s32.totalorder %s992_s29, 3 }
   0xf   : > { %p244_p9 = pnand %p852_p7, %p243_p8 }
  0x10   : > { %s854_s14 = sshll.u32 (!%p244_p9), %s1063_s6, 1  ;;  %s272_s23 = sand.u32 (!%p244_p9), 1, %s984_s27  }
  0x11   : > { %247 = sbr.rel (%p244_p9) target bundleno = 765 (0x2fd), region = 48  ;;  %p276_p10 = scmp.lt.s32.totalorder (!%p244_p9), %s854_s14, 3 }
  0x12   : > { %s874_s25 = sshll.u32 (!%p244_p9), %s1063_s6, 5  ;;  %s776_s16 = scalar_lea.sflag (!%p244_p9), [#allocation4], %s272_s23 }
  0x13   : > { %s788_s15 = scalar_lea.hbm (!%p244_p9), %s1214_s7, %s874_s25  ;;  %s998_s18 = smov (!%p244_p9), [#allocation3]  }
  0x14   : > { %s936_s6 = sshll.u32 (!%p244_p9), %s998_s18, 4  ;;  %s937_s6 = int_to_ptr.vmem [resolvable:$false] %s936_s6 }
  0x16   : > { %v284_v1 = vlaneseq  ;;  %v994_v3 = vmov 0.0   ;;  %v370_v4 = vld [vmem:[%s1209_s2 + $0x18] sm:$0xff]  ;;  %v368_v5 = vld [vmem:[%s1209_s2 + $0x8] sm:$0xff]  ;;  %s1222_s14 = smov (!%p276_p10, %s854_s14), 3  ;;  %v995_v6 = vmov 0   ;;  %v369_v11 = vld [vmem:[%s1209_s2 + $0x10] sm:$0xff] }
  0x17   : > { %468 = vmatprep.mubr.f32.mxu0 %v994_v3  ;;  %614 = vmatprep.mubr.f32.mxu1 %v994_v3  ;;  %s855_s19 = sshll.u32 %s1222_s14, 1  ;;  %v367_v12 = vld [vmem:[%s1209_s2] sm:$0xff]  ;;  %vm304_vm0 = vcmask 1040384   ;;  %v516_v18 = vld [vmem:[%s1211_s4 + $0x18] sm:$0xff]  ;;  %v515_v21 = vld [vmem:[%s1211_s4 + $0x10] sm:$0xff]  ;;  %vm357_vm1 = vcmask 1041408  }
  0x18   : > { %v1092_v2 = vshrl.u32 %v284_v1, 7  ;;  %919 = vset.pattern.permute.xlu1 %v995_v6  ;;  %918 = vset.pattern.permute.xlu0 %v995_v6  ;;  %s279_s24 = scalar_lea.vmem %s1207_s0, %s855_s19  ;;  %v514_v24 = vld [vmem:[%s1211_s4 + $0x8] sm:$0xff]  ;;  %v513_v25 = vld [vmem:[%s1211_s4] sm:$0xff]  ;;  %v996_v33 = vmov 1983009808   ;;  %vm360_vm2 = vcmask 1043456  }
  0x19   : > { %388 = vperm.xlu0 %918, %v370_v4   ;;  %378 = vperm.xlu1 %919, %v368_v5   ;;  %v282_v13 = vld [vmem:[%s279_s24] sm:$0xf]  ;;  %v327_v34 = vunpack.c.l.s4 %v996_v33  ;;  %vm391_vm3 = vcmask 64512   ;;  %v364_v56 = vld [vmem:[%s1208_s1 + $0x8] sm:$0xff]  ;;  %v365_v57 = vld [vmem:[%s1208_s1 + $0x10] sm:$0xff]  ;;  %vm537_vm4 = vcmask 261120  }
  0x1a   : > { %v286_v7 = vsub.s32 1, %v1092_v2  ;;  %v290_v8 = vsub.s32 3, %v1092_v2  ;;  %v296_v9 = vsub.s32 0, %v1092_v2  ;;  %v300_v10 = vsub.s32 2, %v1092_v2  ;;  %v656_v26 = vld [vmem:[#allocation2] sm:$0x1] }
  0x1b   : > { %v328_v39 = vunpack.c.0.s8 %v327_v34  ;;  %v363_v55 = vld [vmem:[%s1208_s1] sm:$0xff]  ;;  %v366_v58 = vld [vmem:[%s1208_s1 + $0x18] sm:$0xff]  ;;  %s853_s24 = sshll.u32 %s272_s23, 1  ;;  %vm772_vm5 = vcmp.lt.s32.totalorder %v284_v1, 256  ;;  %s938_s19 = scalar_lea.vmem %s937_s6, 64 }
  0x1c   : > { %v287_v14 = vrot.slane %v282_v13, %v286_v7  ;;  %v291_v15 = vrot.slane %v282_v13, %v290_v8  ;;  %v297_v16 = vrot.slane %v282_v13, %v296_v9  ;;  %v301_v17 = vrot.slane %v282_v13, %v300_v10  ;;  %s274_s30 = scalar_lea.vmem [#allocation3], %s853_s24 }
  0x1d   : > { %383 = vperm.xlu0 %918, %v369_v11   ;;  %373 = vperm.xlu1 %919, %v367_v12   ;;  %v331_v44 = vsub.s32 %v328_v39, %v1092_v2  ;;  %s790_s9 = sshll.u32 %s274_s30, 4  ;;  %s791_s9 = int_to_ptr.vmem [resolvable:$true] %s790_s9 }
  0x1e   : > { %v305_v19 = vsel %vm304_vm0, %v287_v14, %v297_v16  ;;  %v306_v20 = vsel %vm304_vm0, %v291_v15, %v301_v17  ;;  %s932_s17 = scalar_lea.vmem %s791_s9, 32  ;;  %p939_p0 = scmp.lt.s32.totalorder %s791_s9, %s937_s6 }
  0x1f   : > { %v307_v22 = vadd.f32 0.1, %v305_v19  ;;  %v308_v23 = vadd.f32 0.1, %v306_v20  ;;  %v341_v48 = vrot.slane %v282_v13, %v331_v44  ;;  %p933_p11 = scmp.ne.s32.totalorder %s791_s9, %s932_s17  ;;  %p940_p1 = scmp.lt.s32.totalorder %s938_s19, %s932_s17 }
  0x21   : > { %534 = vperm.xlu0 %918, %v516_v18   ;;  %920 = vrcp.f32 %v307_v22  ;;  %529 = vperm.xlu1 %919, %v515_v21   ;;  %v342_v50 = vcombine.high %v341_v48, %v341_v48  ;;  %p934_p12 = pnand %p933_p11, %p1080_p5  ;;  %p941_p2 = por %p940_p1, %p939_p0 }
  0x22   : > { %922 = vrcp.f32 %v308_v23 }
  0x23   : > { %p935_p13 = pneg %p934_p12 }
  0x25   : > { %524 = vperm.xlu0 %918, %v514_v24   ;;  %519 = vperm.xlu1 %919, %v513_v25   ;;  %p942_p3 = pnand %p941_p2, %p935_p13 }
  0x29   : > { %659 = vperm.xlu0 %918, %v656_v26  }
  0x2e   : > { %v921_v27 = vpop.eup %920 }
  0x2f   : > { %v923_v28 = vpop.eup %922  ;;  %v311_v29 = vmul.f32 %v921_v27, %v307_v22 }
  0x30   : > { %v312_v30 = vmul.f32 %v923_v28, %v308_v23 }
  0x31   : > { %v313_v31 = vsub.f32 2.0, %v311_v29 }
  0x32   : > { %v314_v32 = vsub.f32 2.0, %v312_v30 }
  0x33   : > { %v315_v35 = vmul.f32 %v921_v27, %v313_v31 }
  0x34   : > { %v316_v36 = vmul.f32 %v923_v28, %v314_v32 }
  0x35   : > { %v317_v37 = vmul.f32 %v315_v35, %v307_v22 }
  0x36   : > { %v318_v38 = vmul.f32 %v316_v36, %v308_v23 }
  0x37   : > { %v319_v40 = vsub.f32 2.0, %v317_v37  ;;  %v511_v37 = vld [vmem:[%s1210_s3 + $0x10] sm:$0xff] }
  0x38   : > { %v320_v41 = vsub.f32 2.0, %v318_v38  ;;  %v512_v38 = vld [vmem:[%s1210_s3 + $0x18] sm:$0xff] }
  0x39   : > { %v321_v42 = vmul.f32 %v319_v40, %v315_v35  ;;  %v509_v35 = vld [vmem:[%s1210_s3] sm:$0xff] }
  0x3a   : > { %v322_v43 = vmul.f32 %v320_v41, %v316_v36  ;;  %v510_v36 = vld [vmem:[%s1210_s3 + $0x8] sm:$0xff] }
  0x3c   : > { %v325_v45 = vcombine.low %v321_v42, %v322_v43 }
  0x3e   : > { %v332_v46 = vrot.slane %v325_v45, %v331_v44 }
  0x40   : > { %v334_v47 = vmul.f32 %v332_v46, %v282_v13 }
  0x42   : > { %v346_v49 = vcombine.low %v334_v47, %v334_v47 }
  0x44   : > { %v353_v51 = vrot.slane %v346_v49, %v331_v44 }
  0x46   : > { %v354_v52 = vcombine.high %v353_v51, %v353_v51  ;;  %v358_v53 = vsel %vm357_vm1, %v341_v48, %v353_v51 }
  0x48   : > { %v359_v54 = vsel %vm357_vm1, %v342_v50, %v354_v52 }
  0x49   : > { %856 = vmatprep.subr.msk.mxu0 %vm360_vm2, %v359_v54 }
  0x4a   : > { %857 = vmatpush1.msk.msra.mxu0 %vm360_vm2, %v358_v53 }
  0x4b   : > { %858 = vmatmul.mubr.msk.f32.vlgmr.msra.gmra.mxu0 %vm391_vm3, %v363_v55 }
  0x4c   : > { %474 = vmatprep.mubr.f32.mxu0 %v994_v3 }
  0x4f   : > { %859 = vmatmul.mubr.msk.f32.gmra.mxu0 %vm391_vm3, %v364_v56 }
  0x50   : > { %480 = vmatprep.mubr.f32.mxu0 %v994_v3 }
  0x53   : > { %860 = vmatmul.mubr.msk.f32.gmra.mxu0 %vm391_vm3, %v365_v57 }
  0x54   : > { %486 = vmatprep.mubr.f32.mxu0 %v994_v3 }
  0x57   : > { %861 = vmatmul.mubr.msk.f32.gmra.mxu0 %vm391_vm3, %v366_v58 }
  0x58   : > { %733 = vmatprep.mubr.f32.mxu0 %v994_v3 }
  0x94   : > { %v389_v62 = vpop.permute.xlu0 %388  ;;  %v379_v4 = vpop.permute.xlu1 %378 }
  0x98   : > { %v384_v6 = vpop.permute.xlu0 %383  ;;  %v374_v13 = vpop.permute.xlu1 %373 }
  0x9c   : > { %v535_v43 = vpop.permute.xlu0 %534  ;;  %v530_v45 = vpop.permute.xlu1 %529 }
  0xa0   : > { %v525_v50 = vpop.permute.xlu0 %524  ;;  %v520_v54 = vpop.permute.xlu1 %519 }
 0x10b   : > { %v470_v59 = vpop.f32.mrf.mxu0 }
 0x10c   : > { %v471_v21 = vadd.f32 %v470_v59, %v374_v13 }
 0x10d   : > { %v472_v60 = vpop.f32.mrf.mxu0 }
 0x10e   : > { %v473_v18 = vadd.f32 %v472_v60, %v374_v13  ;;  %v493_v29 = vmul.f32 0.2, %v471_v21 }
 0x10f   : > { %v476_v61 = vpop.f32.mrf.mxu0 }
 0x110   : > { %v477_v16 = vadd.f32 %v476_v61, %v379_v4  ;;  %v494_v27 = vmul.f32 0.2, %v473_v18  ;;  %v501_v34 = vmax.f32 %v471_v21, %v493_v29 }
 0x111   : > { %v478_v63 = vpop.f32.mrf.mxu0 }
 0x112   : > { %v479_v14 = vadd.f32 %v478_v63, %v379_v4  ;;  %v495_v25 = vmul.f32 0.2, %v477_v16  ;;  %v502_v33 = vmax.f32 %v473_v18, %v494_v27  ;;  %v997_v27 = vmov 1966171168  }
 0x113   : > { %v482_v0 = vpop.f32.mrf.mxu0 }
 0x114   : > { %v483_v11 = vadd.f32 %v482_v0, %v384_v6  ;;  %v496_v23 = vmul.f32 0.2, %v479_v14  ;;  %v503_v32 = vmax.f32 %v477_v16, %v495_v25 }
 0x115   : > { %v484_v5 = vpop.f32.mrf.mxu0 }
 0x116   : > { %v485_v8 = vadd.f32 %v484_v5, %v384_v6  ;;  %v497_v22 = vmul.f32 0.2, %v483_v11  ;;  %v504_v31 = vmax.f32 %v479_v14, %v496_v23  ;;  %v655_v14 = vld [vmem:[%s1212_s5] sm:$0x1] }
 0x117   : > { %v488_v7 = vpop.f32.mrf.mxu0 }
 0x118   : > { %v489_v10 = vadd.f32 %v488_v7, %v389_v62  ;;  %v498_v19 = vmul.f32 0.2, %v485_v8  ;;  %v505_v30 = vmax.f32 %v483_v11, %v497_v22 }
 0x119   : > { %v490_v12 = vpop.f32.mrf.mxu0 }
 0x11a   : > { %v491_v15 = vadd.f32 %v490_v12, %v389_v62  ;;  %v499_v17 = vmul.f32 0.2, %v489_v10  ;;  %v506_v28 = vmax.f32 %v485_v8, %v498_v19 }
 0x11c   : > { %v500_v20 = vmul.f32 0.2, %v491_v15  ;;  %v507_v26 = vmax.f32 %v489_v10, %v499_v17 }
 0x11e   : > { %v508_v24 = vmax.f32 %v491_v15, %v500_v20  ;;  %v660_v15 = vpop.permute.xlu0 %659 }
 0x11f   : > { %v665_v16 = vrot.slane %v660_v15, %v296_v9 }
 0x120   : > { %574 = vmatprep.subr.mxu1 %v508_v24 }
 0x121   : > { %575 = vmatpush1.msra.mxu1 %v507_v26 }
 0x122   : > { %576 = vmatprep.subr.mxu1 %v506_v28  ;;  %v756_v28 = vunpack.c.l.s4 %v997_v27 }
 0x123   : > { %577 = vmatpush1.msra.mxu1 %v505_v30 }
 0x124   : > { %578 = vmatprep.subr.mxu1 %v504_v31  ;;  %v757_v9 = vunpack.c.0.s8 %v756_v28 }
 0x125   : > { %579 = vmatpush1.msra.mxu1 %v503_v32 }
 0x126   : > { %580 = vmatprep.subr.mxu1 %v502_v33  ;;  %v760_v30 = vsub.s32 %v757_v9, %v1092_v2 }
 0x127   : > { %581 = vmatpush1.msra.mxu1 %v501_v34 }
 0x128   : > { %862 = vmatmul.mubr.msk.f32.vlgmr.msra.gmra.mxu1 %vm537_vm4, %v509_v35 }
 0x129   : > { %620 = vmatprep.mubr.f32.mxu1 %v994_v3 }
 0x12c   : > { %863 = vmatmul.mubr.msk.f32.gmra.mxu1 %vm537_vm4, %v510_v36 }
 0x12d   : > { %626 = vmatprep.mubr.f32.mxu1 %v994_v3 }
 0x130   : > { %864 = vmatmul.mubr.msk.f32.gmra.mxu1 %vm537_vm4, %v511_v37 }
 0x131   : > { %632 = vmatprep.mubr.f32.mxu1 %v994_v3 }
 0x134   : > { %865 = vmatmul.mubr.msk.f32.gmra.mxu1 %vm537_vm4, %v512_v38 }
 0x1e8   : > { %v616_v39 = vpop.f32.mrf.mxu1 }
 0x1e9   : > { %v617_v60 = vadd.f32 %v616_v39, %v520_v54 }
 0x1ea   : > { %v618_v40 = vpop.f32.mrf.mxu1 }
 0x1eb   : > { %v619_v57 = vadd.f32 %v618_v40, %v520_v54  ;;  %v639_v7 = vmul.f32 0.2, %v617_v60 }
 0x1ec   : > { %v622_v41 = vpop.f32.mrf.mxu1 }
 0x1ed   : > { %v623_v55 = vadd.f32 %v622_v41, %v525_v50  ;;  %v640_v5 = vmul.f32 0.2, %v619_v57  ;;  %v647_v13 = vmax.f32 %v617_v60, %v639_v7 }
 0x1ee   : > { %v624_v42 = vpop.f32.mrf.mxu1 }
 0x1ef   : > { %v625_v52 = vadd.f32 %v624_v42, %v525_v50  ;;  %v641_v0 = vmul.f32 0.2, %v623_v55  ;;  %v648_v12 = vmax.f32 %v619_v57, %v640_v5 }
 0x1f0   : > { %v628_v44 = vpop.f32.mrf.mxu1 }
 0x1f1   : > { %v629_v51 = vadd.f32 %v628_v44, %v530_v45  ;;  %v642_v62 = vmul.f32 0.2, %v625_v52  ;;  %v649_v11 = vmax.f32 %v623_v55, %v641_v0 }
 0x1f2   : > { %v630_v46 = vpop.f32.mrf.mxu1 }
 0x1f3   : > { %v631_v48 = vadd.f32 %v630_v46, %v530_v45  ;;  %v643_v61 = vmul.f32 0.2, %v629_v51  ;;  %v650_v10 = vmax.f32 %v625_v52, %v642_v62 }
 0x1f4   : > { %v634_v47 = vpop.f32.mrf.mxu1 }
 0x1f5   : > { %v635_v49 = vadd.f32 %v634_v47, %v535_v43  ;;  %v644_v58 = vmul.f32 0.2, %v631_v48  ;;  %v651_v8 = vmax.f32 %v629_v51, %v643_v61 }
 0x1f6   : > { %v636_v3 = vpop.f32.mrf.mxu1 }
 0x1f7   : > { %v637_v53 = vadd.f32 %v636_v3, %v535_v43  ;;  %v645_v56 = vmul.f32 0.2, %v635_v49  ;;  %v652_v6 = vmax.f32 %v631_v48, %v644_v58 }
 0x1f9   : > { %v646_v59 = vmul.f32 0.2, %v637_v53  ;;  %v653_v4 = vmax.f32 %v635_v49, %v645_v56 }
 0x1fb   : > { %v654_v63 = vmax.f32 %v637_v53, %v646_v59 }
 0x1fd   : > { %693 = vmatprep.subr.mxu0 %v654_v63 }
 0x1fe   : > { %694 = vmatpush1.msra.mxu0 %v653_v4 }
 0x1ff   : > { %695 = vmatprep.subr.mxu0 %v652_v6 }
 0x200   : > { %696 = vmatpush1.msra.mxu0 %v651_v8 }
 0x201   : > { %697 = vmatprep.subr.mxu0 %v650_v10 }
 0x202   : > { %698 = vmatpush1.msra.mxu0 %v649_v11 }
 0x203   : > { %699 = vmatprep.subr.mxu0 %v648_v12 }
 0x204   : > { %700 = vmatpush1.msra.mxu0 %v647_v13 }
 0x205   : > { %866 = vmatmul.mubr.msk.f32.vlgmr.msra.gmra.mxu0 %vm537_vm4, %v655_v14 }
 0x2c5   : > { %v735_v17 = vpop.f32.mrf.mxu0 }
 0x2c6   : > { %v736_v18 = vadd.f32 %v735_v17, %v665_v16 }
 0x2c7   : > { %v737_v19 = vpop.f32.mrf.mxu0 }
 0x2c8   : > { %v867_v20 = vmul.f32 -1.442695, %v736_v18  ;;  %v738_v21 = vadd.f32 %v737_v19, %v665_v16 }
 0x2ca   : > { %924 = vpow2.f32 %v867_v20  ;;  %v868_v22 = vmul.f32 -1.442695, %v738_v21 }
 0x2cc   : > { %926 = vpow2.f32 %v868_v22 }
 0x2d7   : > { %v925_v23 = vpop.eup %924 }
 0x2d8   : > { %v746_v24 = vadd.f32 1.0, %v925_v23 }
 0x2d9   : > { %v927_v25 = vpop.eup %926 }
 0x2da   : > { %v747_v26 = vadd.f32 1.0, %v927_v25  ;;  %928 = vrcp.f32 %v746_v24 }
 0x2dc   : > { %930 = vrcp.f32 %v747_v26 }
 0x2e7   : > { %v929_v29 = vpop.eup %928 }
 0x2e9   : > { %v931_v31 = vpop.eup %930 }
 0x2ea   : > { %v754_v32 = vcombine.low %v929_v29, %v931_v31 }
 0x2ec   : > { %v761_v33 = vrot.slane %v754_v32, %v760_v30 }
 0x2ee   : > { %v768_v34 = vrot.slane %v761_v33, %v760_v30 }
 0x2f0   : > { %774 = vst.msk [vmem:[%s274_s30] sm:$0x3] %vm772_vm5, %v768_v34 }
 0x2f1   : > { %945 = shalt.err (!%p942_p3)
}
 0x2f2   : > { %s946_s20 = scalar_lea.hbm %s788_s15, 32  ;;  %s950_s23 = scalar_lea.hbm %s1214_s7, 64 }
 0x2f3   : > { %p947_p4 = scmp.ne.s32.totalorder %s788_s15, %s946_s20  ;;  %p951_p9 = scmp.lt.s32.totalorder %s788_s15, %s1214_s7 }
 0x2f4   : > { %p952_p10 = scmp.lt.s32.totalorder %s950_s23, %s946_s20 }
 0x2f5   : > { %p948_p7 = pnand %p947_p4, %p1080_p5 }
 0x2f6   : > { %p953_p11 = por %p952_p10, %p951_p9 }
 0x2f7   : > { %p949_p8 = pneg %p948_p7 }
 0x2f9   : > { %p954_p12 = pnand %p953_p11, %p949_p8 }
 0x2fb   : > { %957 = shalt.err (!%p954_p12)
}
 0x2fc   : > { %875 = dma.vmem_to_hbm [thread:$0]  (%p1080_p5), %s791_s9, 32, %s788_s15, %s776_s16  }
 0x2fd PF: > { %p881_p13 = scmp.ge.s32.totalorder %s992_s29, 2  ;;  %s802_s30 = sand.u32 1, %s980_s26  }
 0x2fe   : > { %s803_s10 = scalar_lea.sflag [#allocation4], %s802_s30 }
 0x2ff   : > { %p878_p0 = pnand %p881_p13, %p1084_p6 }
 0x301   : > { %p879_p1 = pneg %p878_p0 }
 0x303   : > { %975 = dma.done.wait (%p879_p1), %s803_s10, 32  }
 0x304   : > { %977 = vsyncadd (%p879_p1), %s803_s10, 4294967264  ;;  %p19_p2 = scmp.ge.s32.totalorder %s1067_s8, 4   ;;  %s1217_s26 = smov %s984_s27 }
 0x305   : > { %s1218_s27 = smov %s988_s28  ;;  %s1219_s28 = smov %s1078_s11 }
 0x306   : > { %s1220_s29 = smov %s1067_s8  ;;  %21 = sbr.rel (!%p19_p2) target bundleno = 6 (0x6), region = 83 }
 0x30b   :  { %808 = vsyncpa [#allocation4], 1 }
 0x30c   :  { %810 = vsyncpa [#allocation4 + $0x1], 1 }

</bundles_post_ra>
